<compile_context>
chip_gen: v6e
topology: v6e:2x2x1
jax: 0.10.0
libtpu: 0.0.40
codegen_flags: <defaults>
</compile_context>

<pallas_src>
import functools

import jax
import jax.numpy as jnp
from jax.experimental import pallas as pl
from jax.experimental.pallas import tpu as pltpu


def _round_up(v, m):
    return ((v + m - 1) // m) * m


def _svm_kernel(x_ref, w_ref, b_ref, o_ref):
    # x_ref: (tm, K)       VMEM  (streamed over batch)
    # w_ref: (K, n_pad)    VMEM  (pre-transposed in wrapper -> direct MXU feed)
    # b_ref: (1, n_pad)    VMEM  (resident)
    # o_ref: (tm, n_pad)   VMEM  (lane-dense: n_pad is a multiple of 128)
    acc = jnp.dot(x_ref[...], w_ref[...], preferred_element_type=jnp.float32)
    o_ref[...] = (acc + b_ref[...]).astype(o_ref.dtype)


@functools.partial(jax.jit, static_argnames=("block_b",))
def svm_forward(x, weight, bias, *, block_b=2048):
    """y = x @ weight.T + bias, matching torch.nn.Linear semantics.

    x:      (B, input_size) float32
    weight: (num_classes, input_size) float32   (PyTorch layout, NOT transposed)
    bias:   (num_classes,) float32
    """
    B, K = x.shape
    N, K2 = weight.shape
    assert K == K2, "weight inner dim must match x feature dim"

    # --- one-time wrapper-side weight prep (tiny: 512x128 f32 = 256 KiB) -------
    # Pad class dim to a full lane group (128) so the output tile is lane-dense,
    # and pre-transpose to (K, n_pad) so the kernel body is a plain (M,K)x(K,N)
    # matmul (no in-kernel vxpose per grid step).
    n_pad = max(128, _round_up(N, 128))
    w_pad = jnp.zeros((K, n_pad), dtype=weight.dtype).at[:, :N].set(weight.T)
    b_pad = jnp.zeros((1, n_pad), dtype=bias.dtype).at[0, :N].set(bias)

    # --- batch tiling: no wrapper-side pad/copy of x ----------------------------
    # Trailing ragged block (B % tm != 0) is clipped by Pallas: out-of-range reads
    # only feed rows whose writes are masked, so results are unaffected.
    half = _round_up(pl.cdiv(B, 2), 8)        # >=2 grid steps when the batch allows,
    tm = min(block_b, max(8, half))           #   so both v7x TensorCores get work
    tm = min(tm, _round_up(B, 8))             # never exceed the (sublane-rounded) batch
    grid = (pl.cdiv(B, tm),)

    # Rough double-buffered VMEM need; only raise the scoped limit when the default
    # (16 MiB v5e / 32 MiB v6e,v7x) would be too small. Stays < v7x's 64 MiB VMEM.
    itemsize = 4
    est_vmem = 2 * tm * (K + n_pad) * itemsize + 2 * (K + 1) * n_pad * itemsize
    cparams = {"dimension_semantics": ("parallel",)}   # batch axis shards across TCs
    if est_vmem > 14 * 1024 * 1024:
        cparams["vmem_limit_bytes"] = min(est_vmem + (8 << 20), 56 << 20)

    flops = 2 * B * K * n_pad
    bytes_accessed = (B * K + K * n_pad + n_pad + B * n_pad) * itemsize

    out = pl.pallas_call(
        _svm_kernel,
        out_shape=jax.ShapeDtypeStruct((B, n_pad), x.dtype),
        grid=grid,
        in_specs=[
            pl.BlockSpec((tm, K), lambda i: (i, 0)),      # x: streamed over batch
            pl.BlockSpec((K, n_pad), lambda i: (0, 0)),   # weight: resident
            pl.BlockSpec((1, n_pad), lambda i: (0, 0)),   # bias: resident
        ],
        out_specs=pl.BlockSpec((tm, n_pad), lambda i: (i, 0)),
        compiler_params=pltpu.CompilerParams(**cparams),
        cost_estimate=pl.CostEstimate(
            flops=flops, transcendentals=0, bytes_accessed=bytes_accessed),
    )(x, w_pad, b_pad)

    return out[:, :N]


if __name__ == "__main__":
    input_size = 512
    num_classes = 10
    batch = 8

    key = jax.random.PRNGKey(0)
    kx, kw, kb = jax.random.split(key, 3)

    # Deterministic synthetic parameters (shapes follow nn.Linear(512, 10)).
    x = jax.random.normal(kx, (batch, input_size), dtype=jnp.float32)
    weight = jax.random.normal(kw, (num_classes, input_size), dtype=jnp.float32) * 0.02
    bias = jax.random.normal(kb, (num_classes,), dtype=jnp.float32) * 0.01

    out = svm_forward(x, weight, bias)
    out = jax.block_until_ready(out)

    # Reference check against plain JAX (same semantics as torch F.linear).
    ref = x @ weight.T + bias
    assert out.shape == (batch, num_classes)
    assert jnp.allclose(out, ref, atol=1e-4, rtol=1e-4)

    print("KERNEL_OK")
</pallas_src>

<mosaic_0001>
module attributes {stable_mosaic.version = 11 : i64} {
  func.func @_svm_kernel(%arg0: i32, %arg1: memref<8x512xf32, #tpu.memory_space<vmem>>, %arg2: memref<512x128xf32, #tpu.memory_space<vmem>>, %arg3: memref<1x128xf32, #tpu.memory_space<vmem>>, %arg4: memref<8x128xf32, #tpu.memory_space<vmem>>) attributes {dimension_semantics = [#tpu.dimension_semantics<parallel>], iteration_bounds = array<i64: 1>, scalar_prefetch = 0 : i64, scratch_operands = 0 : i64, tpu.core_type = #tpu.core_type<tc>, window_params = [{transform_indices = @transform_0, window_bounds = array<i64: 8, 512>}, {pipeline_mode = #tpu.pipeline_mode<synchronous>, transform_indices = @transform_1, window_bounds = array<i64: 512, 128>}, {pipeline_mode = #tpu.pipeline_mode<synchronous>, transform_indices = @transform_2, window_bounds = array<i64: 1, 128>}, {transform_indices = @transform_3, window_bounds = array<i64: 8, 128>}]} {
    %c0 = arith.constant 0 : index
    %c0_0 = arith.constant 0 : index
    %0 = vector.load %arg1[%c0, %c0_0] : memref<8x512xf32, #tpu.memory_space<vmem>>, vector<8x512xf32>
    %c0_1 = arith.constant 0 : index
    %c0_2 = arith.constant 0 : index
    %1 = vector.load %arg2[%c0_1, %c0_2] : memref<512x128xf32, #tpu.memory_space<vmem>>, vector<512x128xf32>
    %cst = arith.constant dense<0.000000e+00> : vector<8x128xf32>
    %2 = tpu.matmul %0, %1, %cst {dimension_numbers = #tpu.dot_dimension_numbers<[1], [0], [0], [1], [0, 0, 1, 1], [], []>} : vector<8x512xf32>, vector<512x128xf32>, vector<8x128xf32> -> vector<8x128xf32>
    %c0_3 = arith.constant 0 : index
    %c0_4 = arith.constant 0 : index
    %3 = vector.load %arg3[%c0_3, %c0_4] : memref<1x128xf32, #tpu.memory_space<vmem>>, vector<1x128xf32>
    %4 = vector.broadcast %3 : vector<1x128xf32> to vector<8x128xf32>
    %5 = arith.addf %2, %4 : vector<8x128xf32>
    %c0_5 = arith.constant 0 : index
    %c0_6 = arith.constant 0 : index
    %6 = vector.load %arg4[%c0_5, %c0_6] : memref<8x128xf32, #tpu.memory_space<vmem>>, vector<8x128xf32>
    tpu.vector_store %arg4[%c0_5, %c0_6], %5 {strides = array<i32>} : memref<8x128xf32, #tpu.memory_space<vmem>>, vector<8x128xf32>,
    return
  }
  func.func @transform_0(%arg0: i32) -> (i32, i32) {
    %c0_i32 = arith.constant 0 : i32
    %c0_i32_0 = arith.constant 0 : i32
    return %arg0, %c0_i32 : i32, i32
  }
  func.func @transform_1(%arg0: i32) -> (i32, i32) {
    %c0_i32 = arith.constant 0 : i32
    %c0_i32_0 = arith.constant 0 : i32
    %c0_i32_1 = arith.constant 0 : i32
    return %c0_i32, %c0_i32_0 : i32, i32
  }
  func.func @transform_2(%arg0: i32) -> (i32, i32) {
    %c0_i32 = arith.constant 0 : i32
    %c0_i32_0 = arith.constant 0 : i32
    %c0_i32_1 = arith.constant 0 : i32
    return %c0_i32, %c0_i32_0 : i32, i32
  }
  func.func @transform_3(%arg0: i32) -> (i32, i32) {
    %c0_i32 = arith.constant 0 : i32
    %c0_i32_0 = arith.constant 0 : i32
    return %arg0, %c0_i32 : i32, i32
  }
}

</mosaic_0001>

<bundles_post_ra>
// kernel: svm_forward.1
= control target key start
LH: loop header
LB: loop body
LE: loop exit
PB: predicated region body
PF: predicated region fallthrough
CT: control target
= control target key end

     0   :  { %s570_s0 = inlined_call_operand.vmem [shape: f32[8,512], index: 0, kind: input, shape index: {}]   ;;  %s571_s1 = inlined_call_operand.vmem [shape: f32[512,128], index: 1, kind: input, shape index: {}]   ;;  %s572_s2 = inlined_call_operand.vmem [shape: f32[1,128], index: 2, kind: input, shape index: {}]   ;;  %s573_s3 = inlined_call_operand.hbm [shape: f32[8,128], index: 3, kind: output, shape index: {}]  }
   0x1   :  { %v50_v0 = vld [vmem:[%s571_s1 + $0xf8] sm:$0xff]  ;;  %v49_v4 = vld [vmem:[%s571_s1 + $0xf0] sm:$0xff]  ;;  %v48_v8 = vld [vmem:[%s571_s1 + $0xe8] sm:$0xff] }
   0x2   :  { %v82_v1 = vld [vmem:[%s571_s1 + $0x1f8] sm:$0xff]  ;;  %246 = vmatprep.subr.mxu0 %v50_v0  ;;  %v81_v5 = vld [vmem:[%s571_s1 + $0x1f0] sm:$0xff]  ;;  %v80_v9 = vld [vmem:[%s571_s1 + $0x1e8] sm:$0xff] }
   0x3   :  { %v34_v2 = vld [vmem:[%s571_s1 + $0x78] sm:$0xff]  ;;  %281 = vmatprep.subr.mxu1 %v82_v1  ;;  %v33_v6 = vld [vmem:[%s571_s1 + $0x70] sm:$0xff]  ;;  %v32_v10 = vld [vmem:[%s571_s1 + $0x68] sm:$0xff] }
   0x4   :  { %v66_v3 = vld [vmem:[%s571_s1 + $0x178] sm:$0xff]  ;;  %247 = vmatpush3.msra.mxu0 %v34_v2  ;;  %v65_v7 = vld [vmem:[%s571_s1 + $0x170] sm:$0xff]  ;;  %v64_v11 = vld [vmem:[%s571_s1 + $0x168] sm:$0xff] }
   0x5   :  { %282 = vmatpush3.msra.mxu1 %v66_v3  ;;  %248 = vmatprep.subr.mxu0 %v49_v4  ;;  %v47_v12 = vld [vmem:[%s571_s1 + $0xe0] sm:$0xff]  ;;  %v46_v16 = vld [vmem:[%s571_s1 + $0xd8] sm:$0xff]  ;;  %v45_v20 = vld [vmem:[%s571_s1 + $0xd0] sm:$0xff] }
   0x6   :  { %283 = vmatprep.subr.mxu1 %v81_v5  ;;  %249 = vmatpush3.msra.mxu0 %v33_v6  ;;  %v79_v13 = vld [vmem:[%s571_s1 + $0x1e0] sm:$0xff]  ;;  %v78_v17 = vld [vmem:[%s571_s1 + $0x1d8] sm:$0xff]  ;;  %v77_v21 = vld [vmem:[%s571_s1 + $0x1d0] sm:$0xff] }
   0x7   :  { %284 = vmatpush3.msra.mxu1 %v65_v7  ;;  %250 = vmatprep.subr.mxu0 %v48_v8  ;;  %v31_v14 = vld [vmem:[%s571_s1 + $0x60] sm:$0xff]  ;;  %v30_v18 = vld [vmem:[%s571_s1 + $0x58] sm:$0xff]  ;;  %v29_v22 = vld [vmem:[%s571_s1 + $0x50] sm:$0xff] }
   0x8   :  { %285 = vmatprep.subr.mxu1 %v80_v9  ;;  %v63_v15 = vld [vmem:[%s571_s1 + $0x160] sm:$0xff]  ;;  %251 = vmatpush3.msra.mxu0 %v32_v10  ;;  %v62_v19 = vld [vmem:[%s571_s1 + $0x158] sm:$0xff]  ;;  %v61_v23 = vld [vmem:[%s571_s1 + $0x150] sm:$0xff] }
   0x9   :  { %286 = vmatpush3.msra.mxu1 %v64_v11  ;;  %252 = vmatprep.subr.mxu0 %v47_v12  ;;  %v44_v24 = vld [vmem:[%s571_s1 + $0xc8] sm:$0xff]  ;;  %v43_v28 = vld [vmem:[%s571_s1 + $0xc0] sm:$0xff]  ;;  %v42_v32 = vld [vmem:[%s571_s1 + $0xb8] sm:$0xff] }
   0xa   :  { %287 = vmatprep.subr.mxu1 %v79_v13  ;;  %253 = vmatpush3.msra.mxu0 %v31_v14  ;;  %v76_v25 = vld [vmem:[%s571_s1 + $0x1c8] sm:$0xff]  ;;  %v75_v29 = vld [vmem:[%s571_s1 + $0x1c0] sm:$0xff]  ;;  %v74_v33 = vld [vmem:[%s571_s1 + $0x1b8] sm:$0xff] }
   0xb   :  { %288 = vmatpush3.msra.mxu1 %v63_v15  ;;  %254 = vmatprep.subr.mxu0 %v46_v16  ;;  %v28_v26 = vld [vmem:[%s571_s1 + $0x48] sm:$0xff]  ;;  %v27_v30 = vld [vmem:[%s571_s1 + $0x40] sm:$0xff]  ;;  %v26_v34 = vld [vmem:[%s571_s1 + $0x38] sm:$0xff] }
   0xc   :  { %289 = vmatprep.subr.mxu1 %v78_v17  ;;  %255 = vmatpush3.msra.mxu0 %v30_v18  ;;  %v60_v27 = vld [vmem:[%s571_s1 + $0x148] sm:$0xff]  ;;  %v59_v31 = vld [vmem:[%s571_s1 + $0x140] sm:$0xff]  ;;  %v58_v35 = vld [vmem:[%s571_s1 + $0x138] sm:$0xff] }
   0xd   :  { %290 = vmatpush3.msra.mxu1 %v62_v19  ;;  %256 = vmatprep.subr.mxu0 %v45_v20  ;;  %v41_v36 = vld [vmem:[%s571_s1 + $0xb0] sm:$0xff]  ;;  %v40_v40 = vld [vmem:[%s571_s1 + $0xa8] sm:$0xff]  ;;  %v39_v44 = vld [vmem:[%s571_s1 + $0xa0] sm:$0xff] }
   0xe   :  { %291 = vmatprep.subr.mxu1 %v77_v21  ;;  %257 = vmatpush3.msra.mxu0 %v29_v22  ;;  %v73_v37 = vld [vmem:[%s571_s1 + $0x1b0] sm:$0xff]  ;;  %v72_v41 = vld [vmem:[%s571_s1 + $0x1a8] sm:$0xff]  ;;  %v71_v45 = vld [vmem:[%s571_s1 + $0x1a0] sm:$0xff] }
   0xf   :  { %292 = vmatpush3.msra.mxu1 %v61_v23  ;;  %258 = vmatprep.subr.mxu0 %v44_v24  ;;  %v25_v38 = vld [vmem:[%s571_s1 + $0x30] sm:$0xff]  ;;  %v24_v42 = vld [vmem:[%s571_s1 + $0x28] sm:$0xff]  ;;  %v23_v46 = vld [vmem:[%s571_s1 + $0x20] sm:$0xff] }
  0x10   :  { %293 = vmatprep.subr.mxu1 %v76_v25  ;;  %259 = vmatpush3.msra.mxu0 %v28_v26  ;;  %v57_v39 = vld [vmem:[%s571_s1 + $0x130] sm:$0xff]  ;;  %v56_v43 = vld [vmem:[%s571_s1 + $0x128] sm:$0xff]  ;;  %v55_v47 = vld [vmem:[%s571_s1 + $0x120] sm:$0xff] }
  0x11   :  { %294 = vmatpush3.msra.mxu1 %v60_v27  ;;  %260 = vmatprep.subr.mxu0 %v43_v28  ;;  %v38_v48 = vld [vmem:[%s571_s1 + $0x98] sm:$0xff] }
  0x12   :  { %295 = vmatprep.subr.mxu1 %v75_v29  ;;  %261 = vmatpush3.msra.mxu0 %v27_v30  ;;  %v70_v49 = vld [vmem:[%s571_s1 + $0x198] sm:$0xff] }
  0x13   :  { %296 = vmatpush3.msra.mxu1 %v59_v31  ;;  %262 = vmatprep.subr.mxu0 %v42_v32 }
  0x14   :  { %297 = vmatprep.subr.mxu1 %v74_v33  ;;  %263 = vmatpush3.msra.mxu0 %v26_v34 }
  0x15   :  { %298 = vmatpush3.msra.mxu1 %v58_v35  ;;  %264 = vmatprep.subr.mxu0 %v41_v36 }
  0x16   :  { %299 = vmatprep.subr.mxu1 %v73_v37  ;;  %265 = vmatpush3.msra.mxu0 %v25_v38 }
  0x17   :  { %300 = vmatpush3.msra.mxu1 %v57_v39  ;;  %266 = vmatprep.subr.mxu0 %v40_v40 }
  0x18   :  { %301 = vmatprep.subr.mxu1 %v72_v41  ;;  %267 = vmatpush3.msra.mxu0 %v24_v42 }
  0x19   :  { %302 = vmatpush3.msra.mxu1 %v56_v43 }
  0x1a   :  { %8 = vsyncpa [#allocation3], 0  ;;  %268 = vmatprep.subr.mxu0 %v39_v44  ;;  %303 = vmatprep.subr.mxu1 %v71_v45  ;;  %v22_v50 = vld [vmem:[%s571_s1 + $0x18] sm:$0xff]  ;;  %v37_v52 = vld [vmem:[%s571_s1 + $0x90] sm:$0xff]  ;;  %s339_s14 = smov [#allocation2]  }
  0x1b   :  { %v54_v51 = vld [vmem:[%s571_s1 + $0x118] sm:$0xff]  ;;  %269 = vmatpush3.msra.mxu0 %v23_v46  ;;  %304 = vmatpush3.msra.mxu1 %v55_v47  ;;  %v69_v53 = vld [vmem:[%s571_s1 + $0x190] sm:$0xff]  ;;  %v36_v56 = vld [vmem:[%s571_s1 + $0x88] sm:$0xff]  ;;  %s237_s15 = sshll.u32 %s339_s14, 4  ;;  %s238_s15 = int_to_ptr.vmem [resolvable:$true] %s237_s15 }
  0x1c   :  { %270 = vmatprep.subr.mxu0 %v38_v48  ;;  %305 = vmatprep.subr.mxu1 %v70_v49  ;;  %v21_v54 = vld [vmem:[%s571_s1 + $0x10] sm:$0xff]  ;;  %v68_v57 = vld [vmem:[%s571_s1 + $0x188] sm:$0xff]  ;;  %v35_v60 = vld [vmem:[%s571_s1 + $0x80] sm:$0xff]  ;;  %p322_p1 = scmp.lt.s32.totalorder %s238_s15, %s238_s15 }
  0x1d   :  { %v53_v55 = vld [vmem:[%s571_s1 + $0x110] sm:$0xff]  ;;  %271 = vmatpush3.msra.mxu0 %v22_v50  ;;  %306 = vmatpush3.msra.mxu1 %v54_v51  ;;  %v20_v58 = vld [vmem:[%s571_s1 + $0x8] sm:$0xff]  ;;  %v67_v61 = vld [vmem:[%s571_s1 + $0x180] sm:$0xff] }
  0x1e   :  { %272 = vmatprep.subr.mxu0 %v37_v52  ;;  %307 = vmatprep.subr.mxu1 %v69_v53  ;;  %v52_v59 = vld [vmem:[%s571_s1 + $0x108] sm:$0xff]  ;;  %v19_v62 = vld [vmem:[%s571_s1] sm:$0xff]  ;;  %v18_v1 = vld [vmem:[%s570_s0 + $0x18] sm:$0xff] }
  0x1f   :  { %273 = vmatpush3.msra.mxu0 %v21_v54  ;;  %308 = vmatpush3.msra.mxu1 %v53_v55  ;;  %v16_v63 = vld [vmem:[%s570_s0 + $0x8] sm:$0xff]  ;;  %v51_v0 = vld [vmem:[%s571_s1 + $0x100] sm:$0xff]  ;;  %v17_v3 = vld [vmem:[%s570_s0 + $0x10] sm:$0xff] }
  0x20   :  { %274 = vmatprep.subr.mxu0 %v36_v56  ;;  %309 = vmatprep.subr.mxu1 %v68_v57  ;;  %v15_v2 = vld [vmem:[%s570_s0] sm:$0xff]  ;;  %s317_s0 = scalar_lea.vmem %s238_s15, 128 }
  0x21   :  { %275 = vmatpush3.msra.mxu0 %v20_v58  ;;  %310 = vmatpush3.msra.mxu1 %v52_v59  ;;  %v245_v6 = vld [vmem:[%s572_s2] ss:$0 sm:$0xff]  ;;  %p318_p0 = scmp.ne.s32.totalorder %s238_s15, %s317_s0  ;;  %p323_p2 = scmp.lt.s32.totalorder %s317_s0, %s317_s0 }
  0x22   :  { %276 = vmatprep.subr.mxu0 %v35_v60  ;;  %311 = vmatprep.subr.mxu1 %v67_v61 }
  0x23   :  { %277 = vmatpush3.msra.mxu0 %v19_v62  ;;  %154 = vmatprep.mubr.f32.mxu0 %v16_v63  ;;  %p324_p3 = por %p323_p2, %p322_p1 }
  0x24   :  { %312 = vmatpush3.msra.mxu1 %v51_v0  ;;  %224 = vmatprep.mubr.f32.mxu1 %v18_v1 }
  0x25   :  { %155 = vmatmul.mubr.f32.vlgmr.msra.gmra.mxu0 %v15_v2  ;;  %225 = vmatmul.mubr.f32.vlgmr.msra.gmra.mxu1 %v17_v3  ;;  %p325_p4 = pnand %p324_p3, %p318_p0 }
  0xe5   :  { %v278_v4 = vpop.f32.mrf.mxu0  ;;  %v313_v5 = vpop.f32.mrf.mxu1 }
  0xe7   :  { %v279_v7 = vpop.f32.mrf.mxu0  ;;  %v314_v8 = vpop.f32.mrf.mxu1 }
  0xe8   :  { %v280_v9 = vadd.f32 %v279_v7, %v278_v4  ;;  %v315_v11 = vadd.f32 %v314_v8, %v313_v5 }
  0xea   :  { %v157_v10 = vadd.f32 %v280_v9, %v245_v6 }
  0xec   :  { %v227_v12 = vadd.f32 %v315_v11, %v157_v10 }
  0xee   :  { %230 = vst [vmem:[#allocation2] sm:$0xff] %v227_v12 }
  0xef   :  { %328 = shalt.err (!%p325_p4)
}
  0xf0   :  { %240 = dma.vmem_to_hbm [thread:$0]  %s238_s15, 128, %s573_s3, [#allocation3]  }
  0xf1   :  { %337 = dma.done.wait [#allocation3], 128  }
  0xf2   :  { %338 = vsyncadd [#allocation3], 4294967168 }
  0xf3   :  { %244 = vsyncpa [#allocation3], 1 }

</bundles_post_ra>
